<compile_context>
chip_gen: v7x
topology: tpu7x:2x2x1
jax: 0.10.0
libtpu: 0.0.40
codegen_flags: <defaults>
</compile_context>

<pallas_src>
import numpy as np
import jax
import jax.numpy as jnp
from jax import lax
from jax.experimental import pallas as pl
from jax.experimental.pallas import tpu as pltpu


# ----------------------------- weight repacking -----------------------------

def _conv1_band(w1_oihw, W, C1):
    """Band matrix (4*(W+2), 2*W*C1) for conv1 acting on 4 padded input rows.

    Output lane = ph*W*C1 + (w%2)*(W//2)*C1 + (w//2)*C1 + c, i.e. the two row
    parities and the two column parities of each 2x2 pool window land in
    aligned lane halves, so the maxpool becomes two lane-half maxes."""
    Wp2, W2 = W + 2, W // 2
    k = jnp.asarray(w1_oihw, jnp.float32)[:, 0]                    # (C1, 3, 3)
    ph, dh, w, dw, c = np.meshgrid(np.arange(2), np.arange(3), np.arange(W),
                                   np.arange(3), np.arange(C1), indexing='ij')
    ph, dh, w, dw, c = [a.ravel() for a in (ph, dh, w, dw, c)]
    rows = (ph + dh) * Wp2 + (w + dw)
    cols = ph * (W * C1) + (w % 2) * (W2 * C1) + (w // 2) * C1 + c
    vals = k[c, dh, dw]
    return jnp.zeros((4 * Wp2, 2 * W * C1), jnp.float32).at[rows, cols].set(vals)


def _conv2_band(w2_oihw, W2, C1, C2):
    """Band matrix (3*W2*C1, W2*C2): 3x3 conv over the pooled (H2, W2, C1)
    plane with the three w-taps, the zero padding and the C1 contraction
    folded in.  Rows are grouped by the h-offset segment {h-1, h, h+1}."""
    k = jnp.asarray(w2_oihw, jnp.float32)                          # (C2, C1, 3, 3)
    dh, w, dw, c1, c2 = np.meshgrid(np.arange(3), np.arange(W2), np.arange(3),
                                    np.arange(C1), np.arange(C2), indexing='ij')
    dh, w, dw, c1, c2 = [a.ravel() for a in (dh, w, dw, c1, c2)]
    j = w + dw - 1                                                 # pooled col read
    m = (j >= 0) & (j < W2)                                        # w-halo is implicit
    dh, w, dw, c1, c2, j = dh[m], w[m], dw[m], c1[m], c2[m], j[m]
    rows = (dh * W2 + j) * C1 + c1
    cols = w * C2 + c2
    vals = k[c2, c1, dh, dw]
    return jnp.zeros((3 * W2 * C1, W2 * C2), jnp.float32).at[rows, cols].set(vals)


# --------------------------------- kernel -----------------------------------

def _make_kernel(B, H2, W2, C1, C2, NCP, cdt, fuse_conv2):
    WC1 = 2 * W2 * C1          # = W*C1  (conv1 lanes per row parity)
    K1 = W2 * C1               # pooled row width in lanes

    def kernel(x_ref, w1_ref, b1_ref, w2_ref, b2_ref, wf_ref, bf_ref, out_ref):
        # conv1 for both rows of every 2x2 window: (B*H2, 4*(W+2)) @ (., 2*W*C1)
        c1 = jnp.dot(x_ref[...], w1_ref[...], preferred_element_type=jnp.float32)
        # 2x2 maxpool: row-pair then column-pair are aligned lane halves (VPU).
        m1 = jnp.maximum(c1[:, :WC1], c1[:, WC1:])                 # (B*H2, W*C1)
        p = jnp.maximum(m1[:, :K1], m1[:, K1:])                    # (B*H2, W2*C1)
        # bias + ReLU after the (monotone) max -- identical result, 4x fewer lanes.
        p = jnp.maximum(p + b1_ref[...], 0.0)

        # conv2: h-halo via shifted copies (zero rows at image borders); the
        # w-halo / 3x3 taps / C1 contraction live in the band weight w2_ref.
        p3 = p.reshape(B, H2, K1)
        z = jnp.zeros((B, 1, K1), jnp.float32)
        pu = jnp.concatenate([z, p3[:, :H2 - 1, :]], axis=1).reshape(B * H2, K1)
        pd = jnp.concatenate([p3[:, 1:, :], z], axis=1).reshape(B * H2, K1)

        if fuse_conv2:
            # one K = 3*K1 (=192) dot: single weight load on the 256-deep MXU.
            lhs2 = jnp.concatenate([pu, p, pd], axis=1).astype(cdt)
            c2 = jnp.dot(lhs2, w2_ref[...], preferred_element_type=jnp.float32)
        else:
            # v5e/v5p path: 128-deep MXU, keep three accumulating K=64 dots.
            c2 = (jnp.dot(pu.astype(cdt), w2_ref[0:K1, :],
                          preferred_element_type=jnp.float32)
                  + jnp.dot(p.astype(cdt), w2_ref[K1:2 * K1, :],
                            preferred_element_type=jnp.float32)
                  + jnp.dot(pd.astype(cdt), w2_ref[2 * K1:, :],
                            preferred_element_type=jnp.float32))
        r2 = jnp.maximum(c2 + b2_ref[...], 0.0)                    # (B*H2, W2*C2)

        # global-avg-pool BEFORE fc (sum commutes with the linear map; wf_ref is
        # fc_w.T tiled over W2 and pre-scaled by 1/(H2*W2)): fc matmul has M = B
        # instead of B*H2.
        gap = r2.reshape(B, H2, W2 * C2).sum(axis=1)               # (B, W2*C2)
        out_ref[...] = (jnp.dot(gap.astype(cdt), wf_ref[...],
                                preferred_element_type=jnp.float32)
                        + bf_ref[...])

    return kernel


# -------------------------------- wrapper -----------------------------------

def _round_up(a, m):
    return ((a + m - 1) // m) * m


def _cdiv(a, b):
    return (a + b - 1) // b


def _default_fuse_conv2():
    # 3x fewer MXU pushes on the 256-deep v6e/v7x MXU; marginal on 128-deep v5*.
    try:
        kind = jax.devices()[0].device_kind.lower()
    except Exception:
        return True
    return "v5" not in kind


def nano_emotion_cnn_forward(x_nchw, params, block_n=256,
                             compute_dtype=jnp.float32, fuse_conv2=None):
    N, Cin, H, W = x_nchw.shape
    assert Cin == 1 and H % 2 == 0 and W % 2 == 0
    C1 = params['conv1_w'].shape[0]
    C2 = params['conv2_w'].shape[0]
    NC = params['fc_b'].shape[0]
    H2, W2 = H // 2, W // 2
    NCP = ((NC + 127) // 128) * 128                 # lane-dense padded classes
    Wp2 = W + 2
    cdt = jnp.dtype(compute_dtype)
    if fuse_conv2 is None:
        fuse_conv2 = _default_fuse_conv2()

    # Adaptive per-step batch: multiple of 8, at most block_n, padding spread
    # evenly across steps; >= 2 grid steps when N > 8 so the "parallel" batch
    # axis can feed both v7x TensorCores.
    n_steps = max(1, _cdiv(N, block_n))
    if n_steps == 1 and N > 8:
        n_steps = 2
    B = min(block_n, _round_up(_cdiv(N, n_steps), 8))
    n_steps = _cdiv(N, B)
    N_pad = n_steps * B

    # ---- layout plumbing (plain JAX, runs once per call) --------------------
    x = x_nchw.reshape(N, H, W).astype(jnp.float32)
    xpad = jnp.pad(x, ((0, 0), (1, 1), (1, 1)))                    # (N, H+2, W+2)
    # For pooled row i, gather padded rows 2i..2i+3 (the rows feeding conv1
    # output rows 2i and 2i+1) into one lane-dense LHS row of length 4*(W+2).
    xlhs = jnp.concatenate([xpad[:, r:r + H:2, :] for r in range(4)], axis=-1)
    if N_pad != N:
        xlhs = jnp.pad(xlhs, ((0, N_pad - N), (0, 0), (0, 0)))
    xlhs = xlhs.reshape(N_pad * H2, 4 * Wp2).astype(cdt)

    # ---- weight repacking (band matrices built once) ------------------------
    w1b = _conv1_band(params['conv1_w'], W, C1).astype(cdt)        # (4*(W+2), 2*W*C1)
    b1t = jnp.tile(params['conv1_b'].astype(jnp.float32), W2).reshape(1, W2 * C1)
    w2b = _conv2_band(params['conv2_w'], W2, C1, C2).astype(cdt)   # (3*W2*C1, W2*C2)
    b2t = jnp.tile(params['conv2_b'].astype(jnp.float32), W2).reshape(1, W2 * C2)
    wf0 = jnp.zeros((C2, NCP), jnp.float32).at[:, :NC].set(
        params['fc_w'].T.astype(jnp.float32) / (H2 * W2))
    wfs = jnp.tile(wf0, (W2, 1)).astype(cdt)                       # (W2*C2, NCP)
    bfp = jnp.zeros((1, NCP), jnp.float32).at[0, :NC].set(
        params['fc_b'].astype(jnp.float32))

    kernel = _make_kernel(B, H2, W2, C1, C2, NCP, cdt, fuse_conv2)

    grid_spec = pltpu.PrefetchScalarGridSpec(
        num_scalar_prefetch=0,
        grid=(n_steps,),
        in_specs=[
            pl.BlockSpec((B * H2, 4 * Wp2), lambda g: (g, 0)),       # images
            pl.BlockSpec((4 * Wp2, 2 * W * C1), lambda g: (0, 0)),   # conv1 band
            pl.BlockSpec((1, W2 * C1), lambda g: (0, 0)),            # conv1 bias
            pl.BlockSpec((3 * W2 * C1, W2 * C2), lambda g: (0, 0)),  # conv2 band
            pl.BlockSpec((1, W2 * C2), lambda g: (0, 0)),            # conv2 bias
            pl.BlockSpec((W2 * C2, NCP), lambda g: (0, 0)),          # fused fc
            pl.BlockSpec((1, NCP), lambda g: (0, 0)),                # fc bias
        ],
        out_specs=pl.BlockSpec((B, NCP), lambda g: (g, 0)),
    )

    out = pl.pallas_call(
        kernel,
        grid_spec=grid_spec,
        out_shape=jax.ShapeDtypeStruct((N_pad, NCP), jnp.float32),
        compiler_params=pltpu.CompilerParams(
            dimension_semantics=("parallel",),
            vmem_limit_bytes=32 * 1024 * 1024),
    )(xlhs, w1b, b1t, w2b, b2t, wfs, bfp)
    return out[:N, :NC]


# ------------------------------- reference ----------------------------------

def reference_forward(x_nchw, params):
    """Pure-JAX reference matching the PyTorch forward exactly."""
    y = lax.conv_general_dilated(
        x_nchw, params['conv1_w'], window_strides=(1, 1),
        padding=((1, 1), (1, 1)), dimension_numbers=('NCHW', 'OIHW', 'NCHW'))
    y = jnp.maximum(y + params['conv1_b'][None, :, None, None], 0.0)
    y = lax.reduce_window(y, -jnp.inf, lax.max, (1, 1, 2, 2), (1, 1, 2, 2), 'VALID')
    y = lax.conv_general_dilated(
        y, params['conv2_w'], window_strides=(1, 1),
        padding=((1, 1), (1, 1)), dimension_numbers=('NCHW', 'OIHW', 'NCHW'))
    y = jnp.maximum(y + params['conv2_b'][None, :, None, None], 0.0)
    y = jnp.mean(y, axis=(2, 3))                                   # (N, 16)
    return y @ params['fc_w'].T + params['fc_b']


if __name__ == "__main__":
    num_classes = 7
    key = jax.random.PRNGKey(0)
    ks = jax.random.split(key, 7)
    params = {
        'conv1_w': 0.2 * jax.random.normal(ks[0], (8, 1, 3, 3), jnp.float32),
        'conv1_b': 0.1 * jax.random.normal(ks[1], (8,), jnp.float32),
        'conv2_w': 0.2 * jax.random.normal(ks[2], (16, 8, 3, 3), jnp.float32),
        'conv2_b': 0.1 * jax.random.normal(ks[3], (16,), jnp.float32),
        'fc_w': 0.2 * jax.random.normal(ks[4], (num_classes, 16), jnp.float32),
        'fc_b': 0.1 * jax.random.normal(ks[5], (num_classes,), jnp.float32),
    }
    x = jax.random.normal(ks[6], (2, 1, 16, 16), jnp.float32)      # NCHW like PyTorch

    ref = jax.block_until_ready(reference_forward(x, params))

    # f32 path: bit-faithful to the PyTorch module.
    out = jax.block_until_ready(
        nano_emotion_cnn_forward(x, params, compute_dtype=jnp.float32))
    assert out.shape == (2, num_classes)
    assert jnp.allclose(out, ref, atol=1e-4, rtol=1e-4), (out, ref)

    # bf16 operand stream (recommended deployment mode): f32 accumulation,
    # ~1e-2 expected deviation -> looser tolerance.
    out_bf = jax.block_until_ready(
        nano_emotion_cnn_forward(x, params, compute_dtype=jnp.bfloat16))
    assert out_bf.shape == (2, num_classes)
    assert jnp.allclose(out_bf, ref, atol=5e-2, rtol=5e-2), (out_bf, ref)

    print("KERNEL_OK")
</pallas_src>

<mosaic_0001>
module attributes {stable_mosaic.version = 11 : i64} {
  func.func @kernel(%arg0: i32, %arg1: memref<64x72xf32, #tpu.memory_space<vmem>>, %arg2: memref<72x256xf32, #tpu.memory_space<vmem>>, %arg3: memref<1x64xf32, #tpu.memory_space<vmem>>, %arg4: memref<192x128xf32, #tpu.memory_space<vmem>>, %arg5: memref<1x128xf32, #tpu.memory_space<vmem>>, %arg6: memref<128x128xf32, #tpu.memory_space<vmem>>, %arg7: memref<1x128xf32, #tpu.memory_space<vmem>>, %arg8: memref<8x128xf32, #tpu.memory_space<vmem>>) attributes {dimension_semantics = [#tpu.dimension_semantics<parallel>], iteration_bounds = array<i64: 1>, scalar_prefetch = 0 : i64, scratch_operands = 0 : i64, tpu.core_type = #tpu.core_type<tc>, window_params = [{transform_indices = @transform_0, window_bounds = array<i64: 64, 72>}, {pipeline_mode = #tpu.pipeline_mode<synchronous>, transform_indices = @transform_1, window_bounds = array<i64: 72, 256>}, {pipeline_mode = #tpu.pipeline_mode<synchronous>, transform_indices = @transform_2, window_bounds = array<i64: 1, 64>}, {pipeline_mode = #tpu.pipeline_mode<synchronous>, transform_indices = @transform_3, window_bounds = array<i64: 192, 128>}, {pipeline_mode = #tpu.pipeline_mode<synchronous>, transform_indices = @transform_4, window_bounds = array<i64: 1, 128>}, {pipeline_mode = #tpu.pipeline_mode<synchronous>, transform_indices = @transform_5, window_bounds = array<i64: 128, 128>}, {pipeline_mode = #tpu.pipeline_mode<synchronous>, transform_indices = @transform_6, window_bounds = array<i64: 1, 128>}, {transform_indices = @transform_7, window_bounds = array<i64: 8, 128>}]} {
    %c0 = arith.constant 0 : index
    %c0_0 = arith.constant 0 : index
    %0 = vector.load %arg1[%c0, %c0_0] : memref<64x72xf32, #tpu.memory_space<vmem>>, vector<64x72xf32>
    %c0_1 = arith.constant 0 : index
    %c0_2 = arith.constant 0 : index
    %1 = vector.load %arg2[%c0_1, %c0_2] : memref<72x256xf32, #tpu.memory_space<vmem>>, vector<72x256xf32>
    %cst = arith.constant dense<0.000000e+00> : vector<64x256xf32>
    %2 = tpu.matmul %0, %1, %cst {dimension_numbers = #tpu.dot_dimension_numbers<[1], [0], [0], [1], [0, 0, 1, 1], [], []>} : vector<64x72xf32>, vector<72x256xf32>, vector<64x256xf32> -> vector<64x256xf32>
    %3 = vector.extract_strided_slice %2 {offsets = [0, 0], sizes = [64, 128], strides = [1, 1]} : vector<64x256xf32> to vector<64x128xf32>
    %4 = vector.extract_strided_slice %2 {offsets = [0, 128], sizes = [64, 128], strides = [1, 1]} : vector<64x256xf32> to vector<64x128xf32>
    %5 = arith.maximumf %3, %4 : vector<64x128xf32>
    %6 = vector.extract_strided_slice %5 {offsets = [0, 0], sizes = [64, 64], strides = [1, 1]} : vector<64x128xf32> to vector<64x64xf32>
    %7 = vector.extract_strided_slice %5 {offsets = [0, 64], sizes = [64, 64], strides = [1, 1]} : vector<64x128xf32> to vector<64x64xf32>
    %8 = arith.maximumf %6, %7 : vector<64x64xf32>
    %c0_3 = arith.constant 0 : index
    %c0_4 = arith.constant 0 : index
    %9 = vector.load %arg3[%c0_3, %c0_4] : memref<1x64xf32, #tpu.memory_space<vmem>>, vector<1x64xf32>
    %10 = vector.broadcast %9 : vector<1x64xf32> to vector<64x64xf32>
    %11 = arith.addf %8, %10 : vector<64x64xf32>
    %cst_5 = arith.constant 0.000000e+00 : f32
    %12 = vector.broadcast %cst_5 : f32 to vector<64x64xf32>
    %13 = arith.maximumf %11, %12 : vector<64x64xf32>
    %14 = vector.shape_cast %13 : vector<64x64xf32> to vector<8x8x64xf32>
    %cst_6 = arith.constant 0.000000e+00 : f32
    %15 = vector.broadcast %cst_6 : f32 to vector<8x1x64xf32>
    %16 = vector.extract_strided_slice %14 {offsets = [0, 0, 0], sizes = [8, 7, 64], strides = [1, 1, 1]} : vector<8x8x64xf32> to vector<8x7x64xf32>
    %17 = tpu.concatenate %15, %16 in 1 : vector<8x1x64xf32>, vector<8x7x64xf32> -> vector<8x8x64xf32>
    %18 = vector.shape_cast %17 : vector<8x8x64xf32> to vector<64x64xf32>
    %19 = vector.extract_strided_slice %14 {offsets = [0, 1, 0], sizes = [8, 7, 64], strides = [1, 1, 1]} : vector<8x8x64xf32> to vector<8x7x64xf32>
    %20 = tpu.concatenate %19, %15 in 1 : vector<8x7x64xf32>, vector<8x1x64xf32> -> vector<8x8x64xf32>
    %21 = vector.shape_cast %20 : vector<8x8x64xf32> to vector<64x64xf32>
    %22 = tpu.concatenate %18, %13, %21 in 1 : vector<64x64xf32>, vector<64x64xf32>, vector<64x64xf32> -> vector<64x192xf32>
    %c0_7 = arith.constant 0 : index
    %c0_8 = arith.constant 0 : index
    %23 = vector.load %arg4[%c0_7, %c0_8] : memref<192x128xf32, #tpu.memory_space<vmem>>, vector<192x128xf32>
    %cst_9 = arith.constant dense<0.000000e+00> : vector<64x128xf32>
    %24 = tpu.matmul %22, %23, %cst_9 {dimension_numbers = #tpu.dot_dimension_numbers<[1], [0], [0], [1], [0, 0, 1, 1], [], []>} : vector<64x192xf32>, vector<192x128xf32>, vector<64x128xf32> -> vector<64x128xf32>
    %c0_10 = arith.constant 0 : index
    %c0_11 = arith.constant 0 : index
    %25 = vector.load %arg5[%c0_10, %c0_11] : memref<1x128xf32, #tpu.memory_space<vmem>>, vector<1x128xf32>
    %26 = vector.broadcast %25 : vector<1x128xf32> to vector<64x128xf32>
    %27 = arith.addf %24, %26 : vector<64x128xf32>
    %cst_12 = arith.constant 0.000000e+00 : f32
    %28 = vector.broadcast %cst_12 : f32 to vector<64x128xf32>
    %29 = arith.maximumf %27, %28 : vector<64x128xf32>
    %30 = vector.shape_cast %29 : vector<64x128xf32> to vector<8x8x128xf32>
    %cst_13 = arith.constant dense<0.000000e+00> : vector<8x128xf32>
    %31 = vector.multi_reduction <add>, %30, %cst_13 [1] : vector<8x8x128xf32> to vector<8x128xf32>
    %c0_14 = arith.constant 0 : index
    %c0_15 = arith.constant 0 : index
    %32 = vector.load %arg6[%c0_14, %c0_15] : memref<128x128xf32, #tpu.memory_space<vmem>>, vector<128x128xf32>
    %cst_16 = arith.constant dense<0.000000e+00> : vector<8x128xf32>
    %33 = tpu.matmul %31, %32, %cst_16 {dimension_numbers = #tpu.dot_dimension_numbers<[1], [0], [0], [1], [0, 0, 1, 1], [], []>} : vector<8x128xf32>, vector<128x128xf32>, vector<8x128xf32> -> vector<8x128xf32>
    %c0_17 = arith.constant 0 : index
    %c0_18 = arith.constant 0 : index
    %34 = vector.load %arg7[%c0_17, %c0_18] : memref<1x128xf32, #tpu.memory_space<vmem>>, vector<1x128xf32>
    %35 = vector.broadcast %34 : vector<1x128xf32> to vector<8x128xf32>
    %36 = arith.addf %33, %35 : vector<8x128xf32>
    %c0_19 = arith.constant 0 : index
    %c0_20 = arith.constant 0 : index
    %37 = vector.load %arg8[%c0_19, %c0_20] : memref<8x128xf32, #tpu.memory_space<vmem>>, vector<8x128xf32>
    tpu.vector_store %arg8[%c0_19, %c0_20], %36 {strides = array<i32>} : memref<8x128xf32, #tpu.memory_space<vmem>>, vector<8x128xf32>,
    return
  }
  func.func @transform_0(%arg0: i32) -> (i32, i32) {
    %c0_i32 = arith.constant 0 : i32
    %c0_i32_0 = arith.constant 0 : i32
    return %arg0, %c0_i32 : i32, i32
  }
  func.func @transform_1(%arg0: i32) -> (i32, i32) {
    %c0_i32 = arith.constant 0 : i32
    %c0_i32_0 = arith.constant 0 : i32
    %c0_i32_1 = arith.constant 0 : i32
    return %c0_i32, %c0_i32_0 : i32, i32
  }
  func.func @transform_2(%arg0: i32) -> (i32, i32) {
    %c0_i32 = arith.constant 0 : i32
    %c0_i32_0 = arith.constant 0 : i32
    %c0_i32_1 = arith.constant 0 : i32
    return %c0_i32, %c0_i32_0 : i32, i32
  }
  func.func @transform_3(%arg0: i32) -> (i32, i32) {
    %c0_i32 = arith.constant 0 : i32
    %c0_i32_0 = arith.constant 0 : i32
    %c0_i32_1 = arith.constant 0 : i32
    return %c0_i32, %c0_i32_0 : i32, i32
  }
  func.func @transform_4(%arg0: i32) -> (i32, i32) {
    %c0_i32 = arith.constant 0 : i32
    %c0_i32_0 = arith.constant 0 : i32
    %c0_i32_1 = arith.constant 0 : i32
    return %c0_i32, %c0_i32_0 : i32, i32
  }
  func.func @transform_5(%arg0: i32) -> (i32, i32) {
    %c0_i32 = arith.constant 0 : i32
    %c0_i32_0 = arith.constant 0 : i32
    %c0_i32_1 = arith.constant 0 : i32
    return %c0_i32, %c0_i32_0 : i32, i32
  }
  func.func @transform_6(%arg0: i32) -> (i32, i32) {
    %c0_i32 = arith.constant 0 : i32
    %c0_i32_0 = arith.constant 0 : i32
    %c0_i32_1 = arith.constant 0 : i32
    return %c0_i32, %c0_i32_0 : i32, i32
  }
  func.func @transform_7(%arg0: i32) -> (i32, i32) {
    %c0_i32 = arith.constant 0 : i32
    %c0_i32_0 = arith.constant 0 : i32
    return %arg0, %c0_i32 : i32, i32
  }
}

</mosaic_0001>

<bundles_post_ra>
// kernel: tpu_custom_call.1
= control target key start
LH: loop header
LB: loop body
LE: loop exit
PB: predicated region body
PF: predicated region fallthrough
CT: control target
= control target key end

     0   :  { %12 = vsyncpa [#allocation3], 0  ;;  %s1301_s0 = inlined_call_operand.hbm [shape: f32[64,72], index: 0, kind: input, shape index: {}]   ;;  %s1302_s1 = inlined_call_operand.hbm [shape: f32[72,256], index: 1, kind: input, shape index: {}]   ;;  %s1303_s2 = inlined_call_operand.vmem [shape: f32[1,64], index: 2, kind: input, shape index: {}]   ;;  %s1304_s3 = inlined_call_operand.hbm [shape: f32[192,128], index: 3, kind: input, shape index: {}]   ;;  %s1305_s4 = inlined_call_operand.vmem [shape: f32[1,128], index: 4, kind: input, shape index: {}]   ;;  %s1306_s5 = inlined_call_operand.hbm [shape: f32[128,128], index: 5, kind: input, shape index: {}]   ;;  %s1307_s6 = inlined_call_operand.vmem [shape: f32[1,128], index: 6, kind: input, shape index: {}]   ;;  %s1308_s7 = inlined_call_operand.hbm [shape: f32[8,128], index: 7, kind: output, shape index: {}]  }
   0x1   :  { %13 = vsyncpa [#allocation6], 0 }
   0x2   :  { %14 = vsyncpa [#allocation9], 0 }
   0x3   :  { %15 = vsyncpa [#allocation4], 0  ;;  %s1036_s24 = smov [#allocation5]   ;;  %s918_s28 = scalar_lea.hbm %s1302_s1, 2304 }
   0x4   :  { %s33_s25 = sshll.u32 %s1036_s24, 4  ;;  %p919_p0 = scmp.ne.s32.totalorder %s1302_s1, %s918_s28  ;;  %s34_s25 = int_to_ptr.vmem [resolvable:$true] %s33_s25 }
   0x5   :  { %p922_p1 = scmp.lt.u32.totalorder %s918_s28, %s1302_s1 }
   0x7   :  { %p924_p2 = pnand %p922_p1, %p919_p0 }
   0x9   :  { %927 = shalt.err (!%p924_p2)
}
   0xa   :  { %s928_s10 = scalar_lea.vmem %s34_s25, 2304  ;;  %p933_p4 = scmp.lt.s32.totalorder %s34_s25, %s34_s25 }
   0xb   :  { %p929_p3 = scmp.ne.s32.totalorder %s34_s25, %s928_s10  ;;  %p934_p5 = scmp.lt.s32.totalorder %s928_s10, %s928_s10 }
   0xd   :  { %p935_p6 = por %p934_p5, %p933_p4 }
   0xf   :  { %p936_p7 = pnand %p935_p6, %p929_p3 }
  0x11   :  { %939 = shalt.err (!%p936_p7)
}
  0x12   :  { %s1037_s11 = smov 256   ;;  %s1038_s12 = smov 16  }
  0x13   :  { %39 = dma.hbm_to_vmem [thread:$0]  %s1302_s1, 2304, %s34_s25, [#allocation6], %s1037_s11, %s1037_s11, %s1038_s12  }
  0x14   :  { %s1039_s15 = smov [#allocation2]   ;;  %s940_s19 = scalar_lea.hbm %s1301_s0, 1024 }
  0x15   :  { %s21_s16 = sshll.u32 %s1039_s15, 4  ;;  %p941_p8 = scmp.ne.s32.totalorder %s1301_s0, %s940_s19  ;;  %s22_s16 = int_to_ptr.vmem [resolvable:$true] %s21_s16 }
  0x16   :  { %p944_p9 = scmp.lt.u32.totalorder %s940_s19, %s1301_s0 }
  0x18   :  { %p946_p10 = pnand %p944_p9, %p941_p8 }
  0x1a   :  { %949 = shalt.err (!%p946_p10)
}
  0x1b   :  { %s950_s24 = scalar_lea.vmem %s22_s16, 1024  ;;  %p955_p12 = scmp.lt.s32.totalorder %s22_s16, %s22_s16 }
  0x1c   :  { %p951_p11 = scmp.ne.s32.totalorder %s22_s16, %s950_s24  ;;  %p956_p13 = scmp.lt.s32.totalorder %s950_s24, %s950_s24 }
  0x1e   :  { %p957_p0 = por %p956_p13, %p955_p12 }
  0x20   :  { %p958_p1 = pnand %p957_p0, %p951_p11 }
  0x22   :  { %961 = shalt.err (!%p958_p1)
}
  0x23   :  { %s1040_s1 = smov 128   ;;  %s1041_s25 = smov 8  }
  0x24   :  { %27 = dma.hbm_to_vmem [thread:$0]  %s1301_s0, 1024, %s22_s16, [#allocation3], %s1040_s1, %s1040_s1, %s1041_s25  }
  0x25   :  { %s1042_s28 = smov [#allocation7]   ;;  %s1043_s30 = smov [#allocation8]  }
  0x26   :  { %s47_s29 = sshll.u32 %s1042_s28, 4  ;;  %s61_s8 = sshll.u32 %s1043_s30, 4  ;;  %s48_s29 = int_to_ptr.vmem [resolvable:$true] %s47_s29  ;;  %s1116_s8 = int_to_ptr.vmem [resolvable:$true] %s61_s8 }
  0x27   :  { %s962_s11 = scalar_lea.hbm %s1304_s3, 3072 }
  0x28   :  { %p963_p2 = scmp.ne.s32.totalorder %s1304_s3, %s962_s11  ;;  %p966_p3 = scmp.lt.u32.totalorder %s962_s11, %s1304_s3 }
  0x2a   :  { %p968_p4 = pnand %p966_p3, %p963_p2 }
  0x2c   :  { %971 = shalt.err (!%p968_p4)
}
  0x2d   :  { %s972_s0 = scalar_lea.vmem %s48_s29, 3072  ;;  %p977_p6 = scmp.lt.s32.totalorder %s48_s29, %s48_s29 }
  0x2e   :  { %p973_p5 = scmp.ne.s32.totalorder %s48_s29, %s972_s0  ;;  %p978_p7 = scmp.lt.s32.totalorder %s972_s0, %s972_s0 }
  0x30   :  { %p979_p8 = por %p978_p7, %p977_p6 }
  0x32   :  { %p980_p9 = pnand %p979_p8, %p973_p5 }
  0x34   :  { %983 = shalt.err (!%p980_p9)
}
  0x35   :  { %53 = dma.hbm_to_vmem [thread:$0]  %s1304_s3, 3072, %s48_s29, [#allocation6], %s1040_s1, %s1040_s1, %s1041_s25  }
  0x36   :  { %s984_s20 = scalar_lea.hbm %s1306_s5, 2048 }
  0x37   :  { %p985_p10 = scmp.ne.s32.totalorder %s1306_s5, %s984_s20  ;;  %p988_p11 = scmp.lt.u32.totalorder %s984_s20, %s1306_s5 }
  0x39   :  { %p990_p12 = pnand %p988_p11, %p985_p10 }
  0x3b   :  { %993 = shalt.err (!%p990_p12)
}
  0x3c   :  { %s994_s26 = scalar_lea.vmem %s1116_s8, 2048  ;;  %p999_p0 = scmp.lt.s32.totalorder %s1116_s8, %s1116_s8 }
  0x3d   :  { %p995_p13 = scmp.ne.s32.totalorder %s1116_s8, %s994_s26  ;;  %p1000_p1 = scmp.lt.s32.totalorder %s994_s26, %s994_s26 }
  0x3f   :  { %p1001_p2 = por %p1000_p1, %p999_p0 }
  0x41   :  { %p1002_p3 = pnand %p1001_p2, %p995_p13 }
  0x43   :  { %1005 = shalt.err (!%p1002_p3)
}
  0x44   :  { %67 = dma.hbm_to_vmem [thread:$0]  %s1306_s5, 2048, %s1116_s8, [#allocation9], %s1040_s1, %s1040_s1, %s1041_s25  }
  0x45   :  { %1028 = dma.done.wait [#allocation3], 1024  }
  0x46   :  { %1029 = vsyncadd [#allocation3], 4294966272 }
  0x47   :  { %1030 = dma.done.wait [#allocation6], 5376  }
  0x48   :  { %1031 = vsyncadd [#allocation6], 4294961920 }
  0x49   :  { %1032 = dma.done.wait [#allocation9], 2048  }
  0x4a   :  { %1033 = vsyncadd [#allocation9], 4294965248  ;;  %v1044_v0 = vmov 0.0   ;;  %v91_v1 = vld [vmem:[#allocation5 + $0x8] sm:$0xff]  ;;  %v93_v2 = vld [vmem:[#allocation5 + $0x18] sm:$0xff]  ;;  %vm108_vm0 = vcmask 588800  }
  0x4b   :  { %197 = vmatprep.mubr.f32.mxu0 %v1044_v0  ;;  %v90_v3 = vld [vmem:[#allocation5] sm:$0xff]  ;;  %v829_v4 = vpack.c.bf16 %v93_v2, %v91_v1  ;;  %v92_v5 = vld [vmem:[#allocation5 + $0x10] sm:$0xff]  ;;  %v95_v6 = vld [vmem:[#allocation5 + $0x28] sm:$0xff]  ;;  %s1045_s5 = smov 64   ;;  %v1046_v59 = vmov 0.0|0.0   ;;  %vm366_vm1 = vcmask 1046528  }
  0x4c   :  { %v97_v7 = vld [vmem:[#allocation5 + $0x38] sm:$0xff]  ;;  %v831_v8 = vpack.c.bf16 %v92_v5, %v90_v3  ;;  %v94_v10 = vld [vmem:[#allocation5 + $0x20] sm:$0xff]  ;;  %v96_v11 = vld [vmem:[#allocation5 + $0x30] sm:$0xff]  ;;  %845 = vmatprep.subr.bf16.mxu1 %v1046_v59  ;;  %vm399_vm2 = vcmask 523264   ;;  %vm341_vm3 = vcmask 1040384   ;;  %vm1047_vm4 = vmmov 0  }
  0x4d   :  { %v833_v9 = vpack.c.bf16 %v97_v7, %v95_v6  ;;  %v99_v12 = vld [vmem:[#allocation5 + $0x48] sm:$0xff]  ;;  %830 = vmatprep.subr.bf16.mxu0 %v829_v4  ;;  %v101_v13 = vld [vmem:[#allocation5 + $0x58] sm:$0xff]  ;;  %v835_v14 = vpack.c.bf16 %v96_v11, %v94_v10  ;;  %v98_v16 = vld [vmem:[#allocation5 + $0x40] sm:$0xff]  ;;  %vm655_vm5 = vcmask 1041409   ;;  %vm657_vm6 = vcmask 1042434   ;;  %s1048_s30 = smov [#allocation10]  }
  0x4e   :  { %832 = vmatpush1.bf16.msra.mxu0 %v831_v8  ;;  %v837_v15 = vpack.c.bf16 %v101_v13, %v99_v12  ;;  %v100_v17 = vld [vmem:[#allocation5 + $0x50] sm:$0xff]  ;;  %v103_v18 = vld [vmem:[#allocation5 + $0x68] sm:$0xff]  ;;  %v105_v19 = vld [vmem:[#allocation5 + $0x78] sm:$0xff]  ;;  %vm659_vm7 = vcmask 1043459   ;;  %vm661_vm8 = vcmask 1044484   ;;  %vm663_vm9 = vcmask 1045509  }
  0x4f   :  { %834 = vmatprep.subr.bf16.mxu0 %v833_v9  ;;  %v839_v20 = vpack.c.bf16 %v100_v17, %v98_v16  ;;  %v841_v21 = vpack.c.bf16 %v105_v19, %v103_v18  ;;  %v102_v22 = vld [vmem:[#allocation5 + $0x60] sm:$0xff]  ;;  %v104_v23 = vld [vmem:[#allocation5 + $0x70] sm:$0xff]  ;;  %v107_v25 = vld [vmem:[#allocation5 + $0x88] sm:$0xff]  ;;  %vm665_vm10 = vcmask 1046534   ;;  %vm667_vm11 = vcmask 1047559   ;;  %s747_s8 = sshll.u32 %s1048_s30, 4  ;;  %s748_s8 = int_to_ptr.vmem [resolvable:$true] %s747_s8 }
  0x50   :  { %v843_v24 = vpack.c.bf16 %v104_v23, %v102_v22  ;;  %v106_v26 = vld [vmem:[#allocation5 + $0x80] sm:$0xff]  ;;  %v83_v28 = vld [vmem:[#allocation2 + $0x8] sm:$0xff]  ;;  %v84_v29 = vld [vmem:[#allocation2 + $0x10] sm:$0xff]  ;;  %s1006_s9 = scalar_lea.vmem %s748_s8, 128  ;;  %p1011_p5 = scmp.lt.s32.totalorder %s748_s8, %s748_s8 }
  0x51   :  { %v82_v27 = vld [vmem:[#allocation2] sm:$0xff]  ;;  %v85_v30 = vld [vmem:[#allocation2 + $0x18] sm:$0xff]  ;;  %v87_v32 = vld [vmem:[#allocation2 + $0x28] sm:$0xff]  ;;  %p1007_p4 = scmp.ne.s32.totalorder %s748_s8, %s1006_s9  ;;  %p1012_p6 = scmp.lt.s32.totalorder %s1006_s9, %s1006_s9 }
  0x52   :  { %836 = vmatpush1.bf16.msra.mxu0 %v835_v14  ;;  %v86_v31 = vld [vmem:[#allocation2 + $0x20] sm:$0xff]  ;;  %v88_v33 = vld [vmem:[#allocation2 + $0x30] sm:$0xff]  ;;  %v89_v34 = vld [vmem:[#allocation2 + $0x38] sm:$0xff] }
  0x53   :  { %838 = vmatprep.subr.bf16.mxu0 %v837_v15  ;;  %v408_v55 = vld [vmem:[#allocation7] sm:$0xff]  ;;  %v409_v56 = vld [vmem:[#allocation7 + $0x8] sm:$0xff]  ;;  %v410_v57 = vld [vmem:[#allocation7 + $0x10] sm:$0xff]  ;;  %p1013_p7 = por %p1012_p6, %p1011_p5 }
  0x54   :  { %v846_v60 = vpack.c.bf16 %v409_v56, %v408_v55  ;;  %v411_v61 = vld [vmem:[#allocation7 + $0x18] sm:$0xff]  ;;  %v412_v2 = vld [vmem:[#allocation7 + $0x20] sm:$0xff]  ;;  %v413_v3 = vld [vmem:[#allocation7 + $0x28] sm:$0xff] }
  0x55   :  { %v849_v63 = vpack.c.bf16 %v411_v61, %v410_v57  ;;  %v852_v5 = vpack.c.bf16 %v413_v3, %v412_v2  ;;  %v414_v6 = vld [vmem:[#allocation7 + $0x30] sm:$0xff]  ;;  %v415_v7 = vld [vmem:[#allocation7 + $0x38] sm:$0xff]  ;;  %v416_v9 = vld [vmem:[#allocation7 + $0x40] sm:$0xff]  ;;  %p1014_p8 = pnand %p1013_p7, %p1007_p4 }
  0x56   :  { %840 = vmatpush1.bf16.msra.mxu0 %v839_v20  ;;  %847 = vmatpush1.bf16.msra.mxu1 %v846_v60  ;;  %v855_v8 = vpack.c.bf16 %v415_v7, %v414_v6  ;;  %v417_v10 = vld [vmem:[#allocation7 + $0x48] sm:$0xff]  ;;  %v418_v12 = vld [vmem:[#allocation7 + $0x50] sm:$0xff]  ;;  %v419_v13 = vld [vmem:[#allocation7 + $0x58] sm:$0xff] }
  0x57   :  { %842 = vmatprep.subr.bf16.mxu0 %v841_v21  ;;  %848 = vmatprep.subr.bf16.mxu1 %v1046_v59  ;;  %v858_v11 = vpack.c.bf16 %v417_v10, %v416_v9  ;;  %v861_v14 = vpack.c.bf16 %v419_v13, %v418_v12  ;;  %v420_v15 = vld [vmem:[#allocation7 + $0x60] sm:$0xff]  ;;  %v421_v16 = vld [vmem:[#allocation7 + $0x68] sm:$0xff]  ;;  %v422_v18 = vld [vmem:[#allocation7 + $0x70] sm:$0xff] }
  0x58   :  { %v864_v17 = vpack.c.bf16 %v421_v16, %v420_v15  ;;  %v423_v19 = vld [vmem:[#allocation7 + $0x78] sm:$0xff]  ;;  %v424_v21 = vld [vmem:[#allocation7 + $0x80] sm:$0xff]  ;;  %v425_v22 = vld [vmem:[#allocation7 + $0x88] sm:$0xff] }
  0x59   :  { %v867_v20 = vpack.c.bf16 %v423_v19, %v422_v18  ;;  %v870_v23 = vpack.c.bf16 %v425_v22, %v424_v21 }
  0x5a   :  { %844 = vmatpush1.bf16.msra.mxu0 %v843_v24  ;;  %850 = vmatpush1.bf16.msra.mxu1 %v849_v63  ;;  %v426_v24 = vld [vmem:[#allocation7 + $0x90] sm:$0xff] }
  0x5b   :  { %149 = vmatprep.subr.mxu0 %v107_v25  ;;  %851 = vmatprep.subr.bf16.mxu1 %v1046_v59  ;;  %v427_v25 = vld [vmem:[#allocation7 + $0x98] sm:$0xff] }
  0x5e   :  { %150 = vmatpush1.msra.mxu0 %v106_v26  ;;  %853 = vmatpush1.bf16.msra.mxu1 %v852_v5  ;;  %v873_v26 = vpack.c.bf16 %v427_v25, %v426_v24 }
  0x5f   :  { %758 = vmatmul.mubr.msk.f32.vlgmr.msra.gmra.mrb[0].mxu0 %vm108_vm0, %v82_v27  ;;  %881 = vmatprep.subr.bf16.mxu0 %v1046_v59  ;;  %v428_v27 = vld [vmem:[#allocation7 + $0xa0] sm:$0xff] }
  0x60   :  { %203 = vmatprep.mubr.f32.mxu0 %v1044_v0  ;;  %854 = vmatprep.subr.bf16.mxu1 %v1046_v59 }
  0x62   :  { %856 = vmatpush1.bf16.msra.mxu1 %v855_v8 }
  0x63   :  { %759 = vmatmul.mubr.msk.f32.gmra.mrb[2].mxu0 %vm108_vm0, %v83_v28  ;;  %857 = vmatprep.subr.bf16.mxu1 %v1046_v59  ;;  %v429_v28 = vld [vmem:[#allocation7 + $0xa8] sm:$0xff] }
  0x64   :  { %209 = vmatprep.mubr.f32.mxu0 %v1044_v0 }
  0x66   :  { %859 = vmatpush1.bf16.msra.mxu1 %v858_v11 }
  0x67   :  { %760 = vmatmul.mubr.msk.f32.gmra.mrb[4].mxu0 %vm108_vm0, %v84_v29  ;;  %860 = vmatprep.subr.bf16.mxu1 %v1046_v59  ;;  %v876_v29 = vpack.c.bf16 %v429_v28, %v428_v27 }
  0x68   :  { %215 = vmatprep.mubr.f32.mxu0 %v1044_v0 }
  0x6a   :  { %862 = vmatpush1.bf16.msra.mxu1 %v861_v14 }
  0x6b   :  { %761 = vmatmul.mubr.msk.f32.gmra.mrb[6].mxu0 %vm108_vm0, %v85_v30  ;;  %863 = vmatprep.subr.bf16.mxu1 %v1046_v59  ;;  %v430_v30 = vld [vmem:[#allocation7 + $0xb0] sm:$0xff] }
  0x6c   :  { %221 = vmatprep.mubr.f32.mxu0 %v1044_v0 }
  0x6e   :  { %865 = vmatpush1.bf16.msra.mxu1 %v864_v17 }
  0x6f   :  { %762 = vmatmul.mubr.msk.f32.gmra.mrb[8].mxu0 %vm108_vm0, %v86_v31  ;;  %866 = vmatprep.subr.bf16.mxu1 %v1046_v59  ;;  %v431_v31 = vld [vmem:[#allocation7 + $0xb8] sm:$0xff] }
  0x70   :  { %227 = vmatprep.mubr.f32.mxu0 %v1044_v0 }
  0x72   :  { %868 = vmatpush1.bf16.msra.mxu1 %v867_v20 }
  0x73   :  { %763 = vmatmul.mubr.msk.f32.gmra.mrb[10].mxu0 %vm108_vm0, %v87_v32  ;;  %869 = vmatprep.subr.bf16.mxu1 %v1046_v59  ;;  %v879_v32 = vpack.c.bf16 %v431_v31, %v430_v30 }
  0x74   :  { %233 = vmatprep.mubr.f32.mxu0 %v1044_v0 }
  0x76   :  { %871 = vmatpush1.bf16.msra.mxu1 %v870_v23 }
  0x77   :  { %764 = vmatmul.mubr.msk.f32.gmra.mrb[12].mxu0 %vm108_vm0, %v88_v33  ;;  %872 = vmatprep.subr.bf16.mxu1 %v1046_v59  ;;  %v766_v33 = vld [vmem:[%s1303_s2] ss:$0 sm:$0xff] }
  0x78   :  { %239 = vmatprep.mubr.f32.mxu0 %v1044_v0 }
  0x7a   :  { %874 = vmatpush1.bf16.msra.mxu1 %v873_v26 }
  0x7b   :  { %765 = vmatmul.mubr.msk.f32.gmra.mrb[14].mxu0 %vm108_vm0, %v89_v34  ;;  %875 = vmatprep.subr.bf16.mxu1 %v1046_v59 }
  0x7c   :  { %826 = vmatprep.mubr.msk.f32.mxu0 %vm1047_vm4, %v1044_v0 }
  0x7e   :  { %877 = vmatpush1.bf16.msra.mxu1 %v876_v29 }
  0x7f   :  { %878 = vmatprep.subr.bf16.mxu1 %v1046_v59 }
  0x82   :  { %880 = vmatpush1.bf16.msra.mxu1 %v879_v32 }
 0x132   :  { %v199_v35 = vpop.f32.mrb[0].mxu0 }
 0x133   :  { %v201_v36 = vpop.f32.mrb[1].mxu0 }
 0x134   :  { %v1169_v37 = vmax.f32 %v199_v35, %v201_v36 }
 0x136   :  { %262 = vrot.lane.b32.xlu0 %v1169_v37, %s1045_s5  ;;  %v205_v38 = vpop.f32.mrb[2].mxu0 }
 0x137   :  { %v207_v39 = vpop.f32.mrb[3].mxu0 }
 0x138   :  { %v1173_v40 = vmax.f32 %v205_v38, %v207_v39 }
 0x13a   :  { %264 = vrot.lane.b32.xlu0 %v1173_v40, %s1045_s5  ;;  %v211_v41 = vpop.f32.mrb[4].mxu0 }
 0x13b   :  { %v213_v42 = vpop.f32.mrb[5].mxu0 }
 0x13c   :  { %v1177_v43 = vmax.f32 %v211_v41, %v213_v42 }
 0x13e   :  { %266 = vrot.lane.b32.xlu1 %v1177_v43, %s1045_s5  ;;  %v217_v44 = vpop.f32.mrb[6].mxu0 }
 0x13f   :  { %v219_v45 = vpop.f32.mrb[7].mxu0 }
 0x140   :  { %v1181_v46 = vmax.f32 %v217_v44, %v219_v45 }
 0x142   :  { %268 = vrot.lane.b32.xlu1 %v1181_v46, %s1045_s5  ;;  %v223_v47 = vpop.f32.mrb[8].mxu0 }
 0x143   :  { %v225_v48 = vpop.f32.mrb[9].mxu0 }
 0x144   :  { %v1185_v49 = vmax.f32 %v223_v47, %v225_v48 }
 0x146   :  { %270 = vrot.lane.b32.xlu0 %v1185_v49, %s1045_s5  ;;  %v229_v50 = vpop.f32.mrb[10].mxu0 }
 0x147   :  { %v231_v51 = vpop.f32.mrb[11].mxu0 }
 0x148   :  { %v1189_v52 = vmax.f32 %v229_v50, %v231_v51 }
 0x14a   :  { %272 = vrot.lane.b32.xlu1 %v1189_v52, %s1045_s5  ;;  %v235_v53 = vpop.f32.mrb[12].mxu0 }
 0x14b   :  { %v237_v54 = vpop.f32.mrb[13].mxu0 }
 0x14c   :  { %v1193_v58 = vmax.f32 %v235_v53, %v237_v54 }
 0x14e   :  { %274 = vrot.lane.b32.xlu0 %v1193_v58, %s1045_s5  ;;  %v241_v62 = vpop.f32.mrb[14].mxu0 }
 0x14f   :  { %v243_v1 = vpop.f32.mrb[15].mxu0 }
 0x150   :  { %v1200_v4 = vmax.f32 %v241_v62, %v243_v1 }
 0x152   :  { %276 = vrot.lane.b32.xlu1 %v1200_v4, %s1045_s5 }
 0x1a8   :  { %v263_v34 = vpop.permute.xlu0 %262 }
 0x1a9   :  { %v286_v35 = vmax.f32 %v1169_v37, %v263_v34 }
 0x1ab   :  { %v301_v36 = vadd.f32 %v766_v33, %v286_v35 }
 0x1ac   :  { %v265_v38 = vpop.permute.xlu0 %264 }
 0x1ad   :  { %v309_v39 = vmax.f32 %v301_v36, 0.0  ;;  %v287_v41 = vmax.f32 %v1173_v40, %v265_v38 }
 0x1af   :  { %v302_v42 = vadd.f32 %v766_v33, %v287_v41  ;;  %375 = vrot.lane.b32.xlu0 %v309_v39, %s1045_s5  ;;  %v350_v44 = vrot.slane %v309_v39, 1  ;;  %v325_v21 = vrot.slane %v309_v39, 7 }
 0x1b0   :  { %v267_v45 = vpop.permute.xlu1 %266 }
 0x1b1   :  { %v310_v47 = vmax.f32 %v302_v42, 0.0  ;;  %v288_v48 = vmax.f32 %v1177_v43, %v267_v45  ;;  %v367_v50 = vsel %vm366_vm1, %v350_v44, 0.0  ;;  %v342_v23 = vsel %vm341_vm3, 0.0, %v325_v21 }
 0x1b2   :  { %768 = vmatprep.mubr.msk.f32.mxu1 %vm399_vm2, %v367_v50 }
 0x1b3   :  { %v303_v37 = vadd.f32 %v766_v33, %v288_v48  ;;  %377 = vrot.lane.b32.xlu1 %v310_v47, %s1045_s5  ;;  %v351_v51 = vrot.slane %v310_v47, 1 }
 0x1b4   :  { %v269_v53 = vpop.permute.xlu1 %268 }
 0x1b5   :  { %v311_v40 = vmax.f32 %v303_v37, 0.0  ;;  %v289_v54 = vmax.f32 %v1181_v46, %v269_v53  ;;  %v368_v55 = vsel %vm366_vm1, %v351_v51, 0.0 }
 0x1b7   :  { %v304_v56 = vadd.f32 %v766_v33, %v289_v54  ;;  %379 = vrot.lane.b32.xlu0 %v311_v40, %s1045_s5  ;;  %v352_v57 = vrot.slane %v311_v40, 1  ;;  %v327_v27 = vrot.slane %v311_v40, 7 }
 0x1b8   :  { %v271_v60 = vpop.permute.xlu0 %270 }
 0x1b9   :  { %v312_v43 = vmax.f32 %v304_v56, 0.0  ;;  %v290_v61 = vmax.f32 %v1185_v49, %v271_v60  ;;  %v369_v62 = vsel %vm366_vm1, %v352_v57, 0.0  ;;  %v344_v30 = vsel %vm341_vm3, 0.0, %v327_v27  ;;  %v624_v56 = vld [vmem:[#allocation8] sm:$0xff]  ;;  %v625_v57 = vld [vmem:[#allocation8 + $0x8] sm:$0xff] }
 0x1ba   :  { %v882_v60 = vpack.c.bf16 %v625_v57, %v624_v56 }
 0x1bb   :  { %v305_v63 = vadd.f32 %v766_v33, %v290_v61  ;;  %381 = vrot.lane.b32.xlu1 %v312_v43, %s1045_s5  ;;  %v353_v1 = vrot.slane %v312_v43, 1  ;;  %v328_v31 = vrot.slane %v312_v43, 7  ;;  %v626_v43 = vld [vmem:[#allocation8 + $0x10] sm:$0xff]  ;;  %v627_v61 = vld [vmem:[#allocation8 + $0x18] sm:$0xff] }
 0x1bc   :  { %v273_v2 = vpop.permute.xlu1 %272  ;;  %883 = vmatpush3.bf16.msra.mxu0 %v882_v60 }
 0x1bd   :  { %v313_v3 = vmax.f32 %v305_v63, 0.0  ;;  %v291_v46 = vmax.f32 %v1189_v52, %v273_v2  ;;  %v370_v5 = vsel %vm366_vm1, %v353_v1, 0.0  ;;  %v345_v34 = vsel %vm341_vm3, 0.0, %v328_v31  ;;  %884 = vmatprep.subr.bf16.mxu0 %v1046_v59  ;;  %v628_v63 = vld [vmem:[#allocation8 + $0x20] sm:$0xff]  ;;  %v629_v1 = vld [vmem:[#allocation8 + $0x28] sm:$0xff] }
 0x1be   :  { %v888_v2 = vpack.c.bf16 %v629_v1, %v628_v63 }
 0x1bf   :  { %v306_v6 = vadd.f32 %v766_v33, %v291_v46  ;;  %383 = vrot.lane.b32.xlu0 %v313_v3, %s1045_s5  ;;  %v354_v7 = vrot.slane %v313_v3, 1  ;;  %v329_v35 = vrot.slane %v313_v3, 7  ;;  %v630_v3 = vld [vmem:[#allocation8 + $0x30] sm:$0xff]  ;;  %v631_v46 = vld [vmem:[#allocation8 + $0x38] sm:$0xff] }
 0x1c0   :  { %v275_v8 = vpop.permute.xlu0 %274 }
 0x1c1   :  { %v314_v9 = vmax.f32 %v306_v6, 0.0  ;;  %v292_v49 = vmax.f32 %v1193_v58, %v275_v8  ;;  %v371_v10 = vsel %vm366_vm1, %v354_v7, 0.0  ;;  %v346_v39 = vsel %vm341_vm3, 0.0, %v329_v35  ;;  %v632_v6 = vld [vmem:[#allocation8 + $0x40] sm:$0xff]  ;;  %v633_v7 = vld [vmem:[#allocation8 + $0x48] sm:$0xff] }
 0x1c2   :  { %v894_v8 = vpack.c.bf16 %v633_v7, %v632_v6 }
 0x1c3   :  { %v307_v11 = vadd.f32 %v766_v33, %v292_v49  ;;  %385 = vrot.lane.b32.xlu1 %v314_v9, %s1045_s5  ;;  %v355_v12 = vrot.slane %v314_v9, 1  ;;  %v330_v41 = vrot.slane %v314_v9, 7  ;;  %v634_v9 = vld [vmem:[#allocation8 + $0x50] sm:$0xff]  ;;  %v635_v49 = vld [vmem:[#allocation8 + $0x58] sm:$0xff] }
 0x1c4   :  { %v277_v13 = vpop.permute.xlu1 %276 }
 0x1c5   :  { %v315_v14 = vmax.f32 %v307_v11, 0.0  ;;  %v293_v52 = vmax.f32 %v1200_v4, %v277_v13  ;;  %v372_v15 = vsel %vm366_vm1, %v355_v12, 0.0  ;;  %v326_v4 = vrot.slane %v310_v47, 7  ;;  %v636_v11 = vld [vmem:[#allocation8 + $0x60] sm:$0xff]  ;;  %v637_v12 = vld [vmem:[#allocation8 + $0x68] sm:$0xff] }
 0x1c6   :  { %v347_v45 = vsel %vm341_vm3, 0.0, %v330_v41  ;;  %v900_v13 = vpack.c.bf16 %v637_v12, %v636_v11 }
 0x1c7   :  { %v308_v16 = vadd.f32 %v766_v33, %v293_v52  ;;  %387 = vrot.lane.b32.xlu0 %v315_v14, %s1045_s5  ;;  %v356_v17 = vrot.slane %v315_v14, 1  ;;  %v343_v26 = vsel %vm341_vm3, 0.0, %v326_v4  ;;  %v331_v47 = vrot.slane %v315_v14, 7  ;;  %v638_v14 = vld [vmem:[#allocation8 + $0x70] sm:$0xff]  ;;  %v639_v52 = vld [vmem:[#allocation8 + $0x78] sm:$0xff] }
 0x1c9   :  { %v316_v18 = vmax.f32 %v308_v16, 0.0  ;;  %v373_v19 = vsel %vm366_vm1, %v356_v17, 0.0  ;;  %v348_v37 = vsel %vm341_vm3, 0.0, %v331_v47  ;;  %v1276_v16 = vld [vmem:[%s1305_s4] ss:$0 sm:$0xff] }
 0x1cb   :  { %389 = vrot.lane.b32.xlu1 %v316_v18, %s1045_s5  ;;  %v357_v58 = vrot.slane %v316_v18, 1  ;;  %v332_v51 = vrot.slane %v316_v18, 7 }
 0x1cd   :  { %v374_v20 = vsel %vm366_vm1, %v357_v58, 0.0  ;;  %v349_v54 = vsel %vm341_vm3, 0.0, %v332_v51 }
 0x221   :  { %v376_v22 = vpop.permute.xlu0 %375 }
 0x222   :  { %v400_v24 = vsel %vm399_vm2, %v342_v23, %v376_v22 }
 0x223   :  { %528 = vmatmul.mubr.f32.vlgmr.msra.gmra.mrb[0].mxu1 %v400_v24 }
 0x224   :  { %769 = vmatprep.mubr.msk.f32.mxu1 %vm399_vm2, %v368_v55 }
 0x225   :  { %v378_v25 = vpop.permute.xlu1 %377 }
 0x226   :  { %v401_v28 = vsel %vm399_vm2, %v343_v26, %v378_v25 }
 0x227   :  { %533 = vmatmul.mubr.f32.gmra.mrb[2].mxu1 %v401_v28 }
 0x228   :  { %770 = vmatprep.mubr.msk.f32.mxu1 %vm399_vm2, %v369_v62  ;;  %v885_v62 = vpack.c.bf16 %v627_v61, %v626_v43 }
 0x229   :  { %v380_v29 = vpop.permute.xlu0 %379 }
 0x22a   :  { %v402_v32 = vsel %vm399_vm2, %v344_v30, %v380_v29  ;;  %886 = vmatpush3.bf16.msra.mxu0 %v885_v62 }
 0x22b   :  { %538 = vmatmul.mubr.f32.gmra.mrb[4].mxu1 %v402_v32  ;;  %887 = vmatprep.subr.bf16.mxu0 %v1046_v59 }
 0x22c   :  { %771 = vmatprep.mubr.msk.f32.mxu1 %vm399_vm2, %v370_v5  ;;  %v891_v5 = vpack.c.bf16 %v631_v46, %v630_v3 }
 0x22d   :  { %v382_v33 = vpop.permute.xlu1 %381 }
 0x22e   :  { %v403_v36 = vsel %vm399_vm2, %v345_v34, %v382_v33  ;;  %889 = vmatpush3.bf16.msra.mxu0 %v888_v2 }
 0x22f   :  { %543 = vmatmul.mubr.f32.gmra.mrb[6].mxu1 %v403_v36  ;;  %890 = vmatprep.subr.bf16.mxu0 %v1046_v59 }
 0x230   :  { %772 = vmatprep.mubr.msk.f32.mxu1 %vm399_vm2, %v371_v10  ;;  %v897_v10 = vpack.c.bf16 %v635_v49, %v634_v9 }
 0x231   :  { %v384_v38 = vpop.permute.xlu0 %383 }
 0x232   :  { %v404_v42 = vsel %vm399_vm2, %v346_v39, %v384_v38  ;;  %892 = vmatpush3.bf16.msra.mxu0 %v891_v5 }
 0x233   :  { %548 = vmatmul.mubr.f32.gmra.mrb[8].mxu1 %v404_v42  ;;  %893 = vmatprep.subr.bf16.mxu0 %v1046_v59 }
 0x234   :  { %773 = vmatprep.mubr.msk.f32.mxu1 %vm399_vm2, %v372_v15  ;;  %v903_v15 = vpack.c.bf16 %v639_v52, %v638_v14 }
 0x235   :  { %v386_v44 = vpop.permute.xlu1 %385 }
 0x236   :  { %v405_v48 = vsel %vm399_vm2, %v347_v45, %v386_v44  ;;  %895 = vmatpush3.bf16.msra.mxu0 %v894_v8 }
 0x237   :  { %553 = vmatmul.mubr.f32.gmra.mrb[10].mxu1 %v405_v48  ;;  %896 = vmatprep.subr.bf16.mxu0 %v1046_v59 }
 0x238   :  { %774 = vmatprep.mubr.msk.f32.mxu1 %vm399_vm2, %v373_v19 }
 0x239   :  { %v388_v50 = vpop.permute.xlu0 %387 }
 0x23a   :  { %v406_v53 = vsel %vm399_vm2, %v348_v37, %v388_v50  ;;  %898 = vmatpush3.bf16.msra.mxu0 %v897_v10 }
 0x23b   :  { %558 = vmatmul.mubr.f32.gmra.mrb[12].mxu1 %v406_v53  ;;  %899 = vmatprep.subr.bf16.mxu0 %v1046_v59 }
 0x23c   :  { %775 = vmatprep.mubr.msk.f32.mxu1 %vm399_vm2, %v374_v20 }
 0x23d   :  { %v390_v40 = vpop.permute.xlu1 %389 }
 0x23e   :  { %v407_v55 = vsel %vm399_vm2, %v349_v54, %v390_v40  ;;  %901 = vmatpush3.bf16.msra.mxu0 %v900_v13 }
 0x23f   :  { %563 = vmatmul.mubr.f32.gmra.mrb[14].mxu1 %v407_v55  ;;  %902 = vmatprep.subr.bf16.mxu0 %v1046_v59 }
 0x242   :  { %904 = vmatpush3.bf16.msra.mxu0 %v903_v15 }
 0x2f6   :  { %v529_v17 = vpop.f32.mrb[0].mxu1 }
 0x2f7   :  { %v530_v18 = vadd.f32 %v1276_v16, %v529_v17  ;;  %v531_v19 = vpop.f32.mrb[1].mxu1 }
 0x2f9   :  { %v568_v58 = vmax.f32 %v530_v18, 0.0 }
 0x2fa   :  { %v534_v20 = vpop.f32.mrb[2].mxu1 }
 0x2fb   :  { %v576_v21 = vrot.slane %v568_v58, 4  ;;  %v535_v59 = vadd.f32 %v1276_v16, %v534_v20  ;;  %v536_v22 = vpop.f32.mrb[3].mxu1 }
 0x2fd   :  { %v577_v23 = vadd.f32 %v576_v21, %v568_v58  ;;  %v569_v4 = vmax.f32 %v535_v59, 0.0 }
 0x2fe   :  { %v539_v24 = vpop.f32.mrb[4].mxu1 }
 0x2ff   :  { %v578_v25 = vrot.slane %v577_v23, 2  ;;  %v582_v0 = vrot.slane %v569_v4, 4  ;;  %v540_v26 = vadd.f32 %v1276_v16, %v539_v24  ;;  %v541_v27 = vpop.f32.mrb[5].mxu1 }
 0x301   :  { %v579_v28 = vadd.f32 %v578_v25, %v577_v23  ;;  %v583_v29 = vadd.f32 %v582_v0, %v569_v4  ;;  %v570_v30 = vmax.f32 %v540_v26, 0.0 }
 0x302   :  { %v544_v31 = vpop.f32.mrb[6].mxu1 }
 0x303   :  { %v584_v32 = vrot.slane %v583_v29, 2  ;;  %v588_v33 = vrot.slane %v570_v30, 4  ;;  %v545_v34 = vadd.f32 %v1276_v16, %v544_v31  ;;  %v546_v35 = vpop.f32.mrb[7].mxu1  ;;  %v580_v36 = vrot.slane %v579_v28, 1 }
 0x305   :  { %v585_v38 = vadd.f32 %v584_v32, %v583_v29  ;;  %v589_v39 = vadd.f32 %v588_v33, %v570_v30  ;;  %v571_v41 = vmax.f32 %v545_v34, 0.0  ;;  %v581_v37 = vadd.f32 %v580_v36, %v579_v28  ;;  %v776_v36 = vld [vmem:[%s1307_s6] ss:$0 sm:$0xff] }
 0x306   :  { %v549_v42 = vpop.f32.mrb[8].mxu1 }
 0x307   :  { %v586_v44 = vrot.slane %v585_v38, 1  ;;  %v590_v45 = vrot.slane %v589_v39, 2  ;;  %v594_v47 = vrot.slane %v571_v41, 4  ;;  %v550_v48 = vadd.f32 %v1276_v16, %v549_v42  ;;  %v551_v50 = vpop.f32.mrb[9].mxu1 }
 0x309   :  { %v587_v51 = vadd.f32 %v586_v44, %v585_v38  ;;  %v591_v53 = vadd.f32 %v590_v45, %v589_v39  ;;  %v595_v40 = vadd.f32 %v594_v47, %v571_v41  ;;  %v572_v54 = vmax.f32 %v550_v48, 0.0 }
 0x30a   :  { %v554_v55 = vpop.f32.mrb[10].mxu1 }
 0x30b   :  { %v656_v56 = vsel %vm655_vm5, %v587_v51, %v581_v37  ;;  %v592_v57 = vrot.slane %v591_v53, 1  ;;  %v596_v60 = vrot.slane %v595_v40, 2  ;;  %v600_v43 = vrot.slane %v572_v54, 4  ;;  %v556_v61 = vpop.f32.mrb[11].mxu1 }
 0x30c   :  { %v555_v62 = vadd.f32 %v1276_v16, %v554_v55 }
 0x30d   :  { %v593_v63 = vadd.f32 %v592_v57, %v591_v53  ;;  %v597_v1 = vadd.f32 %v596_v60, %v595_v40  ;;  %v601_v2 = vadd.f32 %v600_v43, %v572_v54 }
 0x30e   :  { %v573_v3 = vmax.f32 %v555_v62, 0.0  ;;  %v559_v46 = vpop.f32.mrb[12].mxu1 }
 0x30f   :  { %v658_v5 = vsel %vm657_vm6, %v593_v63, %v656_v56  ;;  %v598_v6 = vrot.slane %v597_v1, 1  ;;  %v602_v7 = vrot.slane %v601_v2, 2  ;;  %v560_v8 = vadd.f32 %v1276_v16, %v559_v46  ;;  %v561_v9 = vpop.f32.mrb[13].mxu1 }
 0x310   :  { %v606_v49 = vrot.slane %v573_v3, 4 }
 0x311   :  { %v599_v10 = vadd.f32 %v598_v6, %v597_v1  ;;  %v603_v11 = vadd.f32 %v602_v7, %v601_v2  ;;  %v574_v12 = vmax.f32 %v560_v8, 0.0 }
 0x312   :  { %v607_v13 = vadd.f32 %v606_v49, %v573_v3  ;;  %v564_v14 = vpop.f32.mrb[14].mxu1 }
 0x313   :  { %v660_v52 = vsel %vm659_vm7, %v599_v10, %v658_v5  ;;  %v604_v15 = vrot.slane %v603_v11, 1  ;;  %v612_v17 = vrot.slane %v574_v12, 4  ;;  %v565_v18 = vadd.f32 %v1276_v16, %v564_v14  ;;  %v566_v19 = vpop.f32.mrb[15].mxu1 }
 0x314   :  { %v608_v58 = vrot.slane %v607_v13, 2 }
 0x315   :  { %v605_v20 = vadd.f32 %v604_v15, %v603_v11  ;;  %v613_v21 = vadd.f32 %v612_v17, %v574_v12  ;;  %v575_v59 = vmax.f32 %v565_v18, 0.0 }
 0x316   :  { %v609_v22 = vadd.f32 %v608_v58, %v607_v13 }
 0x317   :  { %v662_v23 = vsel %vm661_vm8, %v605_v20, %v660_v52  ;;  %v614_v4 = vrot.slane %v613_v21, 2  ;;  %v618_v24 = vrot.slane %v575_v59, 4 }
 0x318   :  { %v610_v25 = vrot.slane %v609_v22, 1 }
 0x319   :  { %v615_v0 = vadd.f32 %v614_v4, %v613_v21  ;;  %v619_v26 = vadd.f32 %v618_v24, %v575_v59 }
 0x31a   :  { %v611_v27 = vadd.f32 %v610_v25, %v609_v22 }
 0x31b   :  { %v616_v28 = vrot.slane %v615_v0, 1  ;;  %v620_v29 = vrot.slane %v619_v26, 2 }
 0x31c   :  { %v664_v30 = vsel %vm663_vm9, %v611_v27, %v662_v23 }
 0x31d   :  { %v617_v16 = vadd.f32 %v616_v28, %v615_v0  ;;  %v621_v31 = vadd.f32 %v620_v29, %v619_v26 }
 0x31f   :  { %v622_v32 = vrot.slane %v621_v31, 1  ;;  %v666_v33 = vsel %vm665_vm10, %v617_v16, %v664_v30 }
 0x321   :  { %v623_v34 = vadd.f32 %v622_v32, %v621_v31 }
 0x323   :  { %v668_v35 = vsel %vm667_vm11, %v623_v34, %v666_v33 }
 0x324   :  { %827 = vmatmul.mubr.f32.vlgmr.msra.gmra.mrb[16].mxu0 %v668_v35 }
 0x3f7   :  { %v736_v38 = vpop.f32.mrb[16].mxu0 }
 0x3f8   :  { %v737_v39 = vadd.f32 %v776_v36, %v736_v38  ;;  %v828_v41 = vpop.f32.mrb[17].mxu0 }
 0x3fa   :  { %740 = vst [vmem:[#allocation10] sm:$0xff] %v737_v39 }
 0x3fb   :  { %1017 = shalt.err (!%p1014_p8)
}
 0x3fc   :  { %s1018_s12 = scalar_lea.hbm %s1308_s7, 128 }
 0x3fd   :  { %p1019_p9 = scmp.ne.s32.totalorder %s1308_s7, %s1018_s12  ;;  %p1022_p10 = scmp.lt.u32.totalorder %s1018_s12, %s1308_s7 }
 0x3ff   :  { %p1024_p11 = pnand %p1022_p10, %p1019_p9 }
 0x401   :  { %1027 = shalt.err (!%p1024_p11)
}
 0x402   :  { %750 = dma.vmem_to_hbm [thread:$0]  %s748_s8, 128, %s1308_s7, [#allocation4]  }
 0x403   :  { %1034 = dma.done.wait [#allocation4], 128  }
 0x404   :  { %1035 = vsyncadd [#allocation4], 4294967168 }
 0x405   :  { %754 = vsyncpa [#allocation3], 1 }
 0x406   :  { %755 = vsyncpa [#allocation6], 1 }
 0x407   :  { %756 = vsyncpa [#allocation9], 1 }
 0x408   :  { %757 = vsyncpa [#allocation4], 1 }

</bundles_post_ra>
